<compile_context>
chip_gen: v7x
topology: tpu7x:2x2x1
jax: 0.10.0
libtpu: 0.0.40
codegen_flags: <defaults>
</compile_context>

<pallas_src>
import jax
import jax.numpy as jnp
from jax import lax
from jax.experimental import pallas as pl
from jax.experimental.pallas import tpu as pltpu

LANES = 128
ACC_ROWS = 64                 # (64,128) f32 accumulator = 8 independent vregs
MAX_BLOCK_ROWS = 4096         # (4096,128) f32 block = 2 MiB per input buffer
VMEM_LIMIT_BYTES = 32 * 1024 * 1024


def _round_up(x: int, m: int) -> int:
    return (x + m - 1) // m * m


def _elem_loss(err_f32, t: float, n_grater: int, n_less: int):
    """max(t * err**n_g, (1-t) * err**n_l) with static specializations."""
    def _pow(e, n):
        return e if n == 1 else e ** n
    if n_grater == n_less:
        # err >= 0  =>  max(t*e, (1-t)*e) == max(t, 1-t) * e
        return max(t, 1.0 - t) * _pow(err_f32, n_grater)
    return jnp.maximum(t * _pow(err_f32, n_grater),
                       (1.0 - t) * _pow(err_f32, n_less))


def _make_kernel(t: float, n_grater: int, n_less: int,
                 rows: int, block_rows: int, bpc: int, num_blocks: int):
    t = float(t)
    ragged = (rows % block_rows) != 0

    def kernel(yp_ref, yt_ref, out_ref):
        c = pl.program_id(0)          # partial ("parallel") axis
        i = pl.program_id(1)          # reduction ("arbitrary") axis
        blk_idx = c * bpc + i         # UNCLAMPED block index

        @pl.when(i == 0)
        def _():
            out_ref[...] = jnp.zeros_like(out_ref)

        def block_loss():
            err = jnp.abs(yt_ref[...].astype(jnp.float32)
                          - yp_ref[...].astype(jnp.float32))
            return _elem_loss(err, t, n_grater, n_less)

        # Hot path: full, in-range block -- no masking work at all.
        @pl.when((blk_idx + 1) * block_rows <= rows)
        def _():
            blk = block_loss()
            # (block_rows,128) -> (64,128): 8 independent accumulator vregs,
            # dependent add chains are only block_rows/64 deep.
            out_ref[...] += blk.reshape(-1, ACC_ROWS, LANES).sum(axis=0)

        if ragged:
            # Cold path: the single ragged last block.  Pallas-padded rows are
            # zeroed (select, so dead-branch pow garbage is discarded) before
            # the accumulate.  Runs for exactly one grid step.
            @pl.when(blk_idx == num_blocks - 1)
            def _():
                blk = block_loss()
                row_id = blk_idx * block_rows + lax.broadcasted_iota(
                    jnp.int32, (block_rows, LANES), 0)
                blk = jnp.where(row_id < rows, blk, 0.0)
                out_ref[...] += blk.reshape(-1, ACC_ROWS, LANES).sum(axis=0)
        # Duplicate (clamped) blocks assigned to the second partial satisfy
        # neither predicate: their DMA lands but no compute/accumulate runs.

    return kernel


def asymmetric_loss(y_pred, y_true, *, t: float,
                    n_grater: int = 1, n_less: int = 1):
    """Pallas implementation of AsymmetricLoss.forward (returns a scalar)."""
    assert y_pred.shape == y_true.shape
    assert n_grater >= 1 and n_less >= 1, "LNErrors exponent must be >= 1"
    total = int(y_pred.size)
    if total == 0:
        return jnp.float32(jnp.nan)   # mean over an empty tensor

    yp_flat = y_pred.reshape(-1)
    yt_flat = y_true.reshape(-1)

    n_main = (total // LANES) * LANES
    rows = n_main // LANES

    # < 128-element tail: plain JAX.
    if n_main < total:
        # TODO(synk): for total % 128 != 0 the [:n_main] slice below makes XLA
        # materialize a near-full copy of both inputs before the kernel; an
        # in-kernel lane-tail mask over the unsliced 1-D arrays would avoid it.
        terr = jnp.abs(yt_flat[n_main:].astype(jnp.float32)
                       - yp_flat[n_main:].astype(jnp.float32))
        tail_sum = jnp.sum(_elem_loss(terr, float(t), n_grater, n_less))
    else:
        tail_sum = jnp.float32(0.0)

    if rows == 0:
        return tail_sum / jnp.float32(total)

    # Copy-free reshape when total % 128 == 0 (slice is then the identity).
    yp2 = yp_flat[:n_main].reshape(rows, LANES)
    yt2 = yt_flat[:n_main].reshape(rows, LANES)

    # Round to 64 rows: multiple of every packed sublane tile (8/16/32).
    block_rows = min(MAX_BLOCK_ROWS, _round_up(rows, ACC_ROWS))
    num_blocks = pl.cdiv(rows, block_rows)

    # 2 partials only when there is work to split; otherwise the second
    # partial would be a pure-waste duplicate block.
    # TODO(synk): if plain "parallel" does not core-shard on v7x, switch this
    # axis to pltpu.CORE_PARALLEL guarded by a chip-version query.
    num_partials = 2 if num_blocks >= 2 else 1
    bpc = pl.cdiv(num_blocks, num_partials)        # blocks per partial

    kernel = _make_kernel(t, n_grater, n_less, rows, block_rows, bpc,
                          num_blocks)

    def in_map(c, i):
        # Clamp keeps every DMA in-bounds; duplicated blocks skip compute.
        return (jnp.minimum(c * bpc + i, num_blocks - 1), 0)

    partials = pl.pallas_call(
        kernel,
        out_shape=jax.ShapeDtypeStruct((num_partials * ACC_ROWS, LANES),
                                       jnp.float32),
        grid_spec=pltpu.PrefetchScalarGridSpec(
            num_scalar_prefetch=0,
            grid=(num_partials, bpc),
            in_specs=[
                pl.BlockSpec((block_rows, LANES), in_map),
                pl.BlockSpec((block_rows, LANES), in_map),
            ],
            out_specs=pl.BlockSpec((ACC_ROWS, LANES), lambda c, i: (c, 0)),
        ),
        compiler_params=pltpu.CompilerParams(
            dimension_semantics=("parallel", "arbitrary"),
            vmem_limit_bytes=VMEM_LIMIT_BYTES),
    )(yp2, yt2)

    return (jnp.sum(partials) + tail_sum) / jnp.float32(total)


def asymmetric_loss_ref(y_pred, y_true, *, t: float,
                        n_grater: int = 1, n_less: int = 1):
    err = jnp.abs(y_true.astype(jnp.float32) - y_pred.astype(jnp.float32))
    return jnp.mean(jnp.maximum(t * err ** n_grater,
                                (1.0 - t) * err ** n_less))


if __name__ == "__main__":
    key = jax.random.PRNGKey(0)
    k1, k2, k3, k4, k5, k6 = jax.random.split(key, 6)

    # 1) Small (N, C, H, W) regression batch, f32, element count % 128 == 0
    #    (single ragged block of 16 valid rows inside a 64-row tile).
    shape = (2, 4, 16, 16)
    y_pred = jax.random.normal(k1, shape, dtype=jnp.float32)
    y_true = jax.random.normal(k2, shape, dtype=jnp.float32)
    t = 0.7
    out = jax.block_until_ready(asymmetric_loss(y_pred, y_true, t=t))
    ref = asymmetric_loss_ref(y_pred, y_true, t=t)
    assert jnp.allclose(out, ref, rtol=1e-5, atol=1e-6), (out, ref)

    # 2) Odd element count + bf16 inputs (row mask + JAX tail + native-dtype
    #    HBM path; 64-row block respects the (16,128) bf16 packed tile).
    yp = jax.random.normal(k3, (1317,), dtype=jnp.float32).astype(jnp.bfloat16)
    yt = jax.random.normal(k4, (1317,), dtype=jnp.float32).astype(jnp.bfloat16)
    out2 = jax.block_until_ready(asymmetric_loss(yp, yt, t=0.25))
    ref2 = asymmetric_loss_ref(yp, yt, t=0.25)
    assert jnp.allclose(out2, ref2, rtol=1e-5, atol=1e-6), (out2, ref2)

    # 3) Multi-block case: 3 blocks over 2 partials (one clamped duplicate
    #    block), ragged last block, asymmetric exponents (general max branch).
    rows3 = 2 * MAX_BLOCK_ROWS + 100
    yp = jax.random.normal(k5, (rows3, 128), dtype=jnp.float32)
    yt = jax.random.normal(k6, (rows3, 128), dtype=jnp.float32)
    out3 = jax.block_until_ready(
        asymmetric_loss(yp, yt, t=0.3, n_grater=2, n_less=1))
    ref3 = asymmetric_loss_ref(yp, yt, t=0.3, n_grater=2, n_less=1)
    assert jnp.allclose(out3, ref3, rtol=1e-4, atol=1e-6), (out3, ref3)

    print("KERNEL_OK")
</pallas_src>

<mosaic_0001>
module attributes {stable_mosaic.version = 11 : i64} {
  func.func @kernel(%arg0: i32, %arg1: i32, %arg2: memref<64x128xf32, #tpu.memory_space<vmem>>, %arg3: memref<64x128xf32, #tpu.memory_space<vmem>>, %arg4: memref<64x128xf32, #tpu.memory_space<vmem>>) attributes {dimension_semantics = [#tpu.dimension_semantics<parallel>, #tpu.dimension_semantics<arbitrary>], iteration_bounds = array<i64: 1, 1>, scalar_prefetch = 0 : i64, scratch_operands = 0 : i64, tpu.core_type = #tpu.core_type<tc>, window_params = [{transform_indices = @transform_0, window_bounds = array<i64: 64, 128>}, {transform_indices = @transform_1, window_bounds = array<i64: 64, 128>}, {transform_indices = @transform_2, window_bounds = array<i64: 64, 128>}]} {
    %c1_i32 = arith.constant 1 : i32
    %0 = arith.muli %arg0, %c1_i32 : i32
    %1 = arith.addi %0, %arg1 : i32
    %c0_i32 = arith.constant 0 : i32
    %2 = arith.cmpi eq, %arg1, %c0_i32 : i32
    %3 = arith.extui %2 : i1 to i32
    %c0_i32_0 = arith.constant 0 : i32
    %4 = arith.cmpi ne, %3, %c0_i32_0 : i32
    scf.if %4 {
      %cst = arith.constant 0.000000e+00 : f32
      %13 = vector.broadcast %cst : f32 to vector<64x128xf32>
      %c0 = arith.constant 0 : index
      %c0_5 = arith.constant 0 : index
      %14 = vector.load %arg4[%c0, %c0_5] : memref<64x128xf32, #tpu.memory_space<vmem>>, vector<64x128xf32>
      tpu.vector_store %arg4[%c0, %c0_5], %13 {strides = array<i32>} : memref<64x128xf32, #tpu.memory_space<vmem>>, vector<64x128xf32>,
    } else {
    }
    %c1_i32_1 = arith.constant 1 : i32
    %5 = arith.addi %1, %c1_i32_1 : i32
    %c64_i32 = arith.constant 64 : i32
    %6 = arith.muli %5, %c64_i32 : i32
    %c16_i32 = arith.constant 16 : i32
    %7 = arith.cmpi sle, %6, %c16_i32 : i32
    %8 = arith.extui %7 : i1 to i32
    %c0_i32_2 = arith.constant 0 : i32
    %9 = arith.cmpi ne, %8, %c0_i32_2 : i32
    scf.if %9 {
      %c0 = arith.constant 0 : index
      %c0_5 = arith.constant 0 : index
      %13 = vector.load %arg3[%c0, %c0_5] : memref<64x128xf32, #tpu.memory_space<vmem>>, vector<64x128xf32>
      %c0_6 = arith.constant 0 : index
      %c0_7 = arith.constant 0 : index
      %14 = vector.load %arg2[%c0_6, %c0_7] : memref<64x128xf32, #tpu.memory_space<vmem>>, vector<64x128xf32>
      %15 = arith.subf %13, %14 : vector<64x128xf32>
      %16 = math.absf %15 : vector<64x128xf32>
      %cst = arith.constant 0.699999988 : f32
      %17 = vector.broadcast %cst : f32 to vector<64x128xf32>
      %18 = arith.mulf %17, %16 : vector<64x128xf32>
      %c0_8 = arith.constant 0 : index
      %c0_9 = arith.constant 0 : index
      %19 = vector.load %arg4[%c0_8, %c0_9] : memref<64x128xf32, #tpu.memory_space<vmem>>, vector<64x128xf32>
      %20 = vector.shape_cast %18 : vector<64x128xf32> to vector<1x64x128xf32>
      %cst_10 = arith.constant dense<0.000000e+00> : vector<64x128xf32>
      %21 = vector.multi_reduction <add>, %20, %cst_10 [0] : vector<1x64x128xf32> to vector<64x128xf32>
      %22 = arith.addf %19, %21 : vector<64x128xf32>
      %c0_11 = arith.constant 0 : index
      %c0_12 = arith.constant 0 : index
      %23 = vector.load %arg4[%c0_11, %c0_12] : memref<64x128xf32, #tpu.memory_space<vmem>>, vector<64x128xf32>
      tpu.vector_store %arg4[%c0_11, %c0_12], %22 {strides = array<i32>} : memref<64x128xf32, #tpu.memory_space<vmem>>, vector<64x128xf32>,
    } else {
    }
    %c0_i32_3 = arith.constant 0 : i32
    %10 = arith.cmpi eq, %1, %c0_i32_3 : i32
    %11 = arith.extui %10 : i1 to i32
    %c0_i32_4 = arith.constant 0 : i32
    %12 = arith.cmpi ne, %11, %c0_i32_4 : i32
    scf.if %12 {
      %c0 = arith.constant 0 : index
      %c0_5 = arith.constant 0 : index
      %13 = vector.load %arg3[%c0, %c0_5] : memref<64x128xf32, #tpu.memory_space<vmem>>, vector<64x128xf32>
      %c0_6 = arith.constant 0 : index
      %c0_7 = arith.constant 0 : index
      %14 = vector.load %arg2[%c0_6, %c0_7] : memref<64x128xf32, #tpu.memory_space<vmem>>, vector<64x128xf32>
      %15 = arith.subf %13, %14 : vector<64x128xf32>
      %16 = math.absf %15 : vector<64x128xf32>
      %cst = arith.constant 0.699999988 : f32
      %17 = vector.broadcast %cst : f32 to vector<64x128xf32>
      %18 = arith.mulf %17, %16 : vector<64x128xf32>
      %c64_i32_8 = arith.constant 64 : i32
      %19 = arith.muli %1, %c64_i32_8 : i32
      %20 = tpu.iota {dimensions = array<i32: 0>} : vector<64x128xi32>
      %21 = vector.broadcast %19 : i32 to vector<64x128xi32>
      %22 = arith.addi %21, %20 : vector<64x128xi32>
      %c16_i32_9 = arith.constant 16 : i32
      %23 = vector.broadcast %c16_i32_9 : i32 to vector<64x128xi32>
      %24 = arith.cmpi slt, %22, %23 : vector<64x128xi32>
      %cst_10 = arith.constant 0.000000e+00 : f32
      %25 = vector.broadcast %cst_10 : f32 to vector<64x128xf32>
      %26 = arith.select %24, %18, %25 : vector<64x128xi1>, vector<64x128xf32>
      %c0_11 = arith.constant 0 : index
      %c0_12 = arith.constant 0 : index
      %27 = vector.load %arg4[%c0_11, %c0_12] : memref<64x128xf32, #tpu.memory_space<vmem>>, vector<64x128xf32>
      %28 = vector.shape_cast %26 : vector<64x128xf32> to vector<1x64x128xf32>
      %cst_13 = arith.constant dense<0.000000e+00> : vector<64x128xf32>
      %29 = vector.multi_reduction <add>, %28, %cst_13 [0] : vector<1x64x128xf32> to vector<64x128xf32>
      %30 = arith.addf %27, %29 : vector<64x128xf32>
      %c0_14 = arith.constant 0 : index
      %c0_15 = arith.constant 0 : index
      %31 = vector.load %arg4[%c0_14, %c0_15] : memref<64x128xf32, #tpu.memory_space<vmem>>, vector<64x128xf32>
      tpu.vector_store %arg4[%c0_14, %c0_15], %30 {strides = array<i32>} : memref<64x128xf32, #tpu.memory_space<vmem>>, vector<64x128xf32>,
    } else {
    }
    return
  }
  func.func @transform_0(%arg0: i32, %arg1: i32) -> (i32, i32) {
    %c1_i32 = arith.constant 1 : i32
    %0 = arith.muli %arg0, %c1_i32 : i32
    %1 = arith.addi %0, %arg1 : i32
    %c0_i32 = arith.constant 0 : i32
    %2 = arith.minsi %1, %c0_i32 : i32
    %c0_i32_0 = arith.constant 0 : i32
    %c0_i32_1 = arith.constant 0 : i32
    return %2, %c0_i32_0 : i32, i32
  }
  func.func @transform_1(%arg0: i32, %arg1: i32) -> (i32, i32) {
    %c1_i32 = arith.constant 1 : i32
    %0 = arith.muli %arg0, %c1_i32 : i32
    %1 = arith.addi %0, %arg1 : i32
    %c0_i32 = arith.constant 0 : i32
    %2 = arith.minsi %1, %c0_i32 : i32
    %c0_i32_0 = arith.constant 0 : i32
    %c0_i32_1 = arith.constant 0 : i32
    return %2, %c0_i32_0 : i32, i32
  }
  func.func @transform_2(%arg0: i32, %arg1: i32) -> (i32, i32) {
    %c0_i32 = arith.constant 0 : i32
    %c0_i32_0 = arith.constant 0 : i32
    return %arg0, %c0_i32 : i32, i32
  }
}

</mosaic_0001>

<bundles_post_ra>
// kernel: tpu_custom_call.1
= control target key start
LH: loop header
LB: loop body
LE: loop exit
PB: predicated region body
PF: predicated region fallthrough
CT: control target
= control target key end

     0   :  { %7 = vsyncpa [#allocation3], 0  ;;  %s440_s0 = inlined_call_operand.hbm [shape: f32[16,128], index: 0, kind: input, shape index: {}]   ;;  %s441_s1 = inlined_call_operand.hbm [shape: f32[16,128], index: 1, kind: input, shape index: {}]   ;;  %s442_s2 = inlined_call_operand.hbm [shape: f32[64,128], index: 2, kind: output, shape index: {}]  }
   0x1   :  { %8 = vsyncpa [#allocation6], 0 }
   0x2   :  { %9 = vsyncpa [#allocation4], 0 }
   0x3   :  { %20 = vsyncadd [#allocation3], 768  ;;  %s374_s9 = smov [#allocation2]   ;;  %s302_s13 = scalar_lea.hbm %s440_s0, 256 }
   0x4   :  { %s25_s10 = sshll.u32 %s374_s9, 4  ;;  %p303_p0 = scmp.ne.s32.totalorder %s440_s0, %s302_s13  ;;  %s26_s10 = int_to_ptr.vmem [resolvable:$true] %s25_s10 }
   0x5   :  { %p306_p1 = scmp.lt.u32.totalorder %s302_s13, %s440_s0 }
   0x7   :  { %p308_p2 = pnand %p306_p1, %p303_p0 }
   0x9   :  { %311 = shalt.err (!%p308_p2)
}
   0xa   :  { %s312_s18 = scalar_lea.vmem %s26_s10, 256  ;;  %s316_s19 = scalar_lea.vmem %s26_s10, 1024 }
   0xb   :  { %p313_p3 = scmp.ne.s32.totalorder %s26_s10, %s312_s18  ;;  %p317_p4 = scmp.lt.s32.totalorder %s26_s10, %s26_s10 }
   0xc   :  { %p318_p5 = scmp.lt.s32.totalorder %s316_s19, %s312_s18 }
   0xe   :  { %p319_p6 = por %p318_p5, %p317_p4 }
  0x10   :  { %p320_p7 = pnand %p319_p6, %p313_p3 }
  0x12   :  { %323 = shalt.err (!%p320_p7)
}
  0x13   :  { %s375_s20 = smov 128   ;;  %s376_s21 = smov 8  }
  0x14   :  { %31 = dma.hbm_to_vmem [thread:$0]  %s440_s0, 256, %s26_s10, [#allocation3], %s375_s20, %s375_s20, %s376_s21  }
  0x15   :  { %42 = vsyncadd [#allocation6], 768  ;;  %s377_s24 = smov [#allocation5]   ;;  %s324_s28 = scalar_lea.hbm %s441_s1, 256 }
  0x16   :  { %s47_s25 = sshll.u32 %s377_s24, 4  ;;  %p325_p8 = scmp.ne.s32.totalorder %s441_s1, %s324_s28  ;;  %s48_s25 = int_to_ptr.vmem [resolvable:$true] %s47_s25 }
  0x17   :  { %p328_p9 = scmp.lt.u32.totalorder %s324_s28, %s441_s1 }
  0x19   :  { %p330_p10 = pnand %p328_p9, %p325_p8 }
  0x1b   :  { %333 = shalt.err (!%p330_p10)
}
  0x1c   :  { %s334_s5 = scalar_lea.vmem %s48_s25, 256  ;;  %s338_s0 = scalar_lea.vmem %s48_s25, 1024 }
  0x1d   :  { %p335_p11 = scmp.ne.s32.totalorder %s48_s25, %s334_s5  ;;  %p339_p12 = scmp.lt.s32.totalorder %s48_s25, %s48_s25 }
  0x1e   :  { %p340_p13 = scmp.lt.s32.totalorder %s338_s0, %s334_s5 }
  0x20   :  { %p341_p0 = por %p340_p13, %p339_p12 }
  0x22   :  { %p342_p1 = pnand %p341_p0, %p335_p11 }
  0x24   :  { %345 = shalt.err (!%p342_p1)
}
  0x25   :  { %53 = dma.hbm_to_vmem [thread:$0]  %s441_s1, 256, %s48_s25, [#allocation6], %s375_s20, %s375_s20, %s376_s21  }
  0x26   :  { %368 = dma.done.wait [#allocation3], 1024  }
  0x27   :  { %369 = vsyncadd [#allocation3], 4294966272 }
  0x28   :  { %370 = dma.done.wait [#allocation6], 1024  }
  0x29   :  { %371 = vsyncadd [#allocation6], 4294966272  ;;  %v378_v0 = vmov 0.0   ;;  %v167_v1 = vld [vmem:[#allocation5] sm:$0xff]  ;;  %v168_v3 = vld [vmem:[#allocation5 + $0x8] sm:$0xff]  ;;  %s379_s1 = smov [#allocation7]  }
  0x2a   :  { %268 = vst [vmem:[#allocation7 + $0x10] sm:$0xff] %v378_v0  ;;  %269 = vst [vmem:[#allocation7 + $0x18] sm:$0xff] %v378_v0  ;;  %v175_v2 = vld [vmem:[#allocation2] sm:$0xff]  ;;  %v176_v5 = vld [vmem:[#allocation2 + $0x8] sm:$0xff]  ;;  %s279_s8 = sshll.u32 %s379_s1, 4  ;;  %s280_s8 = int_to_ptr.vmem [resolvable:$true] %s279_s8 }
  0x2b   :  { %270 = vst [vmem:[#allocation7 + $0x20] sm:$0xff] %v378_v0  ;;  %271 = vst [vmem:[#allocation7 + $0x28] sm:$0xff] %v378_v0  ;;  %v183_v4 = vsub.f32 %v167_v1, %v175_v2  ;;  %v184_v6 = vsub.f32 %v168_v3, %v176_v5  ;;  %s346_s9 = scalar_lea.vmem %s280_s8, 1024  ;;  %p351_p3 = scmp.lt.s32.totalorder %s280_s8, %s280_s8 }
  0x2c   :  { %272 = vst [vmem:[#allocation7 + $0x30] sm:$0xff] %v378_v0  ;;  %273 = vst [vmem:[#allocation7 + $0x38] sm:$0xff] %v378_v0  ;;  %p347_p2 = scmp.ne.s32.totalorder %s280_s8, %s346_s9  ;;  %p352_p4 = scmp.lt.s32.totalorder %s346_s9, %s346_s9 }
  0x2d   :  { %v191_v7 = vand.u32 2147483647, %v183_v4  ;;  %v192_v8 = vand.u32 2147483647, %v184_v6 }
  0x2e   :  { %p353_p5 = por %p352_p4, %p351_p3 }
  0x2f   :  { %v199_v9 = vmul.f32 0.7, %v191_v7  ;;  %v200_v10 = vmul.f32 0.7, %v192_v8 }
  0x30   :  { %p354_p6 = pnand %p353_p5, %p347_p2 }
  0x31   :  { %266 = vst [vmem:[#allocation7] sm:$0xff] %v199_v9  ;;  %267 = vst [vmem:[#allocation7 + $0x8] sm:$0xff] %v200_v10 }
  0x32   :  { %357 = shalt.err (!%p354_p6)
}
  0x33   :  { %s358_s12 = scalar_lea.hbm %s442_s2, 1024 }
  0x34   :  { %p359_p7 = scmp.ne.s32.totalorder %s442_s2, %s358_s12  ;;  %p362_p8 = scmp.lt.u32.totalorder %s358_s12, %s442_s2 }
  0x36   :  { %p364_p9 = pnand %p362_p8, %p359_p7 }
  0x38   :  { %367 = shalt.err (!%p364_p9)
}
  0x39   :  { %285 = dma.vmem_to_hbm [thread:$0]  %s280_s8, 1024, %s442_s2, [#allocation4], %s375_s20, %s375_s20, %s376_s21  }
  0x3a   :  { %372 = dma.done.wait [#allocation4], 1024  }
  0x3b   :  { %373 = vsyncadd [#allocation4], 4294966272 }
  0x3c   :  { %289 = vsyncpa [#allocation3], 1 }
  0x3d   :  { %290 = vsyncpa [#allocation6], 1 }
  0x3e   :  { %291 = vsyncpa [#allocation4], 1 }

</bundles_post_ra>
